<compile_context>
chip_gen: v7x
topology: tpu7x:2x2x1
jax: 0.10.0
libtpu: 0.0.40
codegen_flags: <defaults>
</compile_context>

<pallas_src>
import jax
import jax.numpy as jnp
from jax.experimental import pallas as pl
from jax.experimental.pallas import tpu as pltpu


def _round_up(x, m):
    return ((x + m - 1) // m) * m


# ----------------------------------------------------------------------------
# Kernel
# ----------------------------------------------------------------------------
def _mlp_kernel(x_ref, w1_ref, b1_ref, w2_ref, b2_ref, o_ref):
    # x arrives f32; cast to bf16 in-kernel (rides free under the MXU work).
    x_bf = x_ref[...].astype(jnp.bfloat16)
    # Layer 1: (TM, D_in) bf16 @ (D_in, H) bf16 -> f32 accumulation on MXU.
    h = jnp.dot(x_bf, w1_ref[...], preferred_element_type=jnp.float32)
    h = jnp.maximum(h + b1_ref[...], 0.0)                     # bias + ReLU (f32, VPU)
    # Layer 2: bf16 activations, f32 accumulation.
    y = jnp.dot(h.astype(jnp.bfloat16), w2_ref[...],
                preferred_element_type=jnp.float32)
    o_ref[...] = (y + b2_ref[...]).astype(o_ref.dtype)


# ----------------------------------------------------------------------------
# Wrapper
# ----------------------------------------------------------------------------
def prepare_params(w1, b1, w2, b2):
    """Pre-cast weights to bf16 ONCE (hoisted out of the per-call path).

    Returns (w1_bf16, b1_f32[1,H], w2_bf16, b2_f32[1,Dout]).
    """
    hidden = w1.shape[1]
    d_out = w2.shape[1]
    return (w1.astype(jnp.bfloat16),
            b1.reshape(1, hidden).astype(jnp.float32),
            w2.astype(jnp.bfloat16),
            b2.reshape(1, d_out).astype(jnp.float32))


def _choose_block_m(B):
    """Batch tile: multiple of 16 (bf16 packs 2 rows/sublane), >= 2 grid steps
    when B allows (v7x megacore), minimal padding waste, capped at 512."""
    if B <= 16:
        return _round_up(max(B, 1), 8)
    best_bm, best_pad = None, None
    for bm in (16, 32, 64, 128, 256, 512):
        if 2 * bm > B:        # keep grid >= 2 so both v7x TensorCores get work
            break
        pad = _round_up(B, bm) - B
        if best_pad is None or pad <= best_pad:   # ties -> larger tile (fewer steps)
            best_bm, best_pad = bm, pad
    return best_bm if best_bm is not None else 16


def _vmem_budget(block_m, d_in, hidden, d_out, x_bytes, out_bytes):
    # Double-buffered x/out tiles, weights counted 2x to be conservative.
    return (2 * block_m * d_in * x_bytes
            + 2 * block_m * d_out * out_bytes
            + 2 * (d_in * hidden + hidden * d_out) * 2     # bf16 weights
            + 2 * (hidden + d_out) * 4)                    # f32 biases


_VMEM_SOFT_CAP = 28 * 1024 * 1024   # keep 2x budget under v7x's 64 MiB


def mlp_forward(x_nchw, params, *, block_m=None, out_dtype=jnp.float32):
    """Fused MLP forward. x_nchw: (B, C, H, W) f32. Returns (B, d_out) out_dtype."""
    w1_bf, b1_2d, w2_bf, b2_2d = params
    B = x_nchw.shape[0]
    d_in, hidden = w1_bf.shape
    d_out = w2_bf.shape[1]

    # Flatten like torch's x.view(B, -1) (free, contiguous reshape).
    x_flat = x_nchw.reshape(B, d_in)

    if block_m is None:
        block_m = _choose_block_m(B)

    x_bytes = jnp.dtype(x_flat.dtype).itemsize
    out_bytes = jnp.dtype(out_dtype).itemsize
    budget = _vmem_budget(block_m, d_in, hidden, d_out, x_bytes, out_bytes)
    while budget > _VMEM_SOFT_CAP and block_m > 16:
        block_m = max(16, block_m // 2)
        budget = _vmem_budget(block_m, d_in, hidden, d_out, x_bytes, out_bytes)
    vmem_limit = int(min(max(2 * budget, 32 * 1024 * 1024), 60 * 1024 * 1024))

    B_pad = _round_up(B, block_m)
    if B_pad != B:
        x_flat = jnp.pad(x_flat, ((0, B_pad - B), (0, 0)))

    grid = (B_pad // block_m,)
    cost = pl.CostEstimate(
        flops=2 * B_pad * d_in * hidden + 2 * B_pad * hidden * d_out,
        transcendentals=0,
        bytes_accessed=(B_pad * d_in * x_bytes
                        + w1_bf.size * 2 + w2_bf.size * 2
                        + b1_2d.size * 4 + b2_2d.size * 4
                        + B_pad * d_out * out_bytes),
    )

    out = pl.pallas_call(
        _mlp_kernel,
        out_shape=jax.ShapeDtypeStruct((B_pad, d_out), out_dtype),
        grid=grid,
        in_specs=[
            pl.BlockSpec((block_m, d_in), lambda i: (i, 0)),   # x batch tile (f32)
            pl.BlockSpec((d_in, hidden), lambda i: (0, 0)),    # w1, VMEM-resident
            pl.BlockSpec((1, hidden), lambda i: (0, 0)),       # b1
            pl.BlockSpec((hidden, d_out), lambda i: (0, 0)),   # w2, VMEM-resident
            pl.BlockSpec((1, d_out), lambda i: (0, 0)),        # b2
        ],
        out_specs=pl.BlockSpec((block_m, d_out), lambda i: (i, 0)),
        compiler_params=pltpu.CompilerParams(
            dimension_semantics=("parallel",),
            vmem_limit_bytes=vmem_limit,
        ),
        cost_estimate=cost,
    )(x_flat, w1_bf, b1_2d, w2_bf, b2_2d)

    return out[:B]


# ----------------------------------------------------------------------------
# Init & test
# ----------------------------------------------------------------------------
def init_params(key, input_channels, output_channels, h, w, hidden=128):
    """Deterministic PyTorch-Linear-style uniform init (f32 master weights)."""
    d_in = input_channels * h * w
    d_out = output_channels * h * w
    k1, k2, k3, k4 = jax.random.split(key, 4)
    bound1 = 1.0 / jnp.sqrt(d_in)
    bound2 = 1.0 / jnp.sqrt(hidden)
    w1 = jax.random.uniform(k1, (d_in, hidden), jnp.float32, -bound1, bound1)
    b1 = jax.random.uniform(k2, (hidden,), jnp.float32, -bound1, bound1)
    w2 = jax.random.uniform(k3, (hidden, d_out), jnp.float32, -bound2, bound2)
    b2 = jax.random.uniform(k4, (d_out,), jnp.float32, -bound2, bound2)
    return w1, b1, w2, b2


if __name__ == "__main__":
    key = jax.random.PRNGKey(0)
    kx, kp = jax.random.split(key)

    B, C_in, H, W = 2, 4, 16, 16
    C_out = 4

    x = jax.random.normal(kx, (B, C_in, H, W), dtype=jnp.float32)
    w1, b1, w2, b2 = init_params(kp, C_in, C_out, H, W, hidden=128)

    # Weight casts hoisted out of the per-call path (done once).
    params = prepare_params(w1, b1, w2, b2)

    out = mlp_forward(x, params)
    out = jax.block_until_ready(out)
    assert out.shape == (B, C_out * H * W)

    # Reference with the same numerics as the kernel (bf16 operands, f32 acc).
    x_flat = x.reshape(B, -1)
    h_ref = jnp.maximum(
        jnp.dot(x_flat.astype(jnp.bfloat16), w1.astype(jnp.bfloat16),
                preferred_element_type=jnp.float32) + b1, 0.0)
    ref = jnp.dot(h_ref.astype(jnp.bfloat16), w2.astype(jnp.bfloat16),
                  preferred_element_type=jnp.float32) + b2
    assert jnp.allclose(out, ref, atol=2e-2, rtol=2e-2)

    # Loose sanity check against the full-f32 math of the original module.
    ref_f32 = jnp.maximum(x_flat @ w1 + b1, 0.0) @ w2 + b2
    assert jnp.allclose(out, ref_f32, atol=5e-2, rtol=5e-2)

    print("KERNEL_OK")
</pallas_src>

<mosaic_0001>
module attributes {stable_mosaic.version = 11 : i64} {
  func.func @_mlp_kernel(%arg0: i32, %arg1: memref<8x1024xf32, #tpu.memory_space<vmem>>, %arg2: memref<1024x128xbf16, #tpu.memory_space<vmem>>, %arg3: memref<1x128xf32, #tpu.memory_space<vmem>>, %arg4: memref<128x1024xbf16, #tpu.memory_space<vmem>>, %arg5: memref<1x1024xf32, #tpu.memory_space<vmem>>, %arg6: memref<8x1024xf32, #tpu.memory_space<vmem>>) attributes {dimension_semantics = [#tpu.dimension_semantics<parallel>], iteration_bounds = array<i64: 1>, scalar_prefetch = 0 : i64, scratch_operands = 0 : i64, tpu.core_type = #tpu.core_type<tc>, window_params = [{transform_indices = @transform_0, window_bounds = array<i64: 8, 1024>}, {pipeline_mode = #tpu.pipeline_mode<synchronous>, transform_indices = @transform_1, window_bounds = array<i64: 1024, 128>}, {pipeline_mode = #tpu.pipeline_mode<synchronous>, transform_indices = @transform_2, window_bounds = array<i64: 1, 128>}, {pipeline_mode = #tpu.pipeline_mode<synchronous>, transform_indices = @transform_3, window_bounds = array<i64: 128, 1024>}, {pipeline_mode = #tpu.pipeline_mode<synchronous>, transform_indices = @transform_4, window_bounds = array<i64: 1, 1024>}, {transform_indices = @transform_5, window_bounds = array<i64: 8, 1024>}]} {
    %c0 = arith.constant 0 : index
    %c0_0 = arith.constant 0 : index
    %0 = vector.load %arg1[%c0, %c0_0] : memref<8x1024xf32, #tpu.memory_space<vmem>>, vector<8x1024xf32>
    %1 = arith.truncf %0 : vector<8x1024xf32> to vector<8x1024xbf16>
    %c0_1 = arith.constant 0 : index
    %c0_2 = arith.constant 0 : index
    %2 = vector.load %arg2[%c0_1, %c0_2] : memref<1024x128xbf16, #tpu.memory_space<vmem>>, vector<1024x128xbf16>
    %cst = arith.constant dense<0.000000e+00> : vector<8x128xf32>
    %3 = tpu.matmul %1, %2, %cst {dimension_numbers = #tpu.dot_dimension_numbers<[1], [0], [0], [1], [0, 0, 1, 1], [], []>} : vector<8x1024xbf16>, vector<1024x128xbf16>, vector<8x128xf32> -> vector<8x128xf32>
    %c0_3 = arith.constant 0 : index
    %c0_4 = arith.constant 0 : index
    %4 = vector.load %arg3[%c0_3, %c0_4] : memref<1x128xf32, #tpu.memory_space<vmem>>, vector<1x128xf32>
    %5 = vector.broadcast %4 : vector<1x128xf32> to vector<8x128xf32>
    %6 = arith.addf %3, %5 : vector<8x128xf32>
    %cst_5 = arith.constant 0.000000e+00 : f32
    %7 = vector.broadcast %cst_5 : f32 to vector<8x128xf32>
    %8 = arith.maximumf %6, %7 : vector<8x128xf32>
    %9 = arith.truncf %8 : vector<8x128xf32> to vector<8x128xbf16>
    %c0_6 = arith.constant 0 : index
    %c0_7 = arith.constant 0 : index
    %10 = vector.load %arg4[%c0_6, %c0_7] : memref<128x1024xbf16, #tpu.memory_space<vmem>>, vector<128x1024xbf16>
    %cst_8 = arith.constant dense<0.000000e+00> : vector<8x1024xf32>
    %11 = tpu.matmul %9, %10, %cst_8 {dimension_numbers = #tpu.dot_dimension_numbers<[1], [0], [0], [1], [0, 0, 1, 1], [], []>} : vector<8x128xbf16>, vector<128x1024xbf16>, vector<8x1024xf32> -> vector<8x1024xf32>
    %c0_9 = arith.constant 0 : index
    %c0_10 = arith.constant 0 : index
    %12 = vector.load %arg5[%c0_9, %c0_10] : memref<1x1024xf32, #tpu.memory_space<vmem>>, vector<1x1024xf32>
    %13 = vector.broadcast %12 : vector<1x1024xf32> to vector<8x1024xf32>
    %14 = arith.addf %11, %13 : vector<8x1024xf32>
    %c0_11 = arith.constant 0 : index
    %c0_12 = arith.constant 0 : index
    %15 = vector.load %arg6[%c0_11, %c0_12] : memref<8x1024xf32, #tpu.memory_space<vmem>>, vector<8x1024xf32>
    tpu.vector_store %arg6[%c0_11, %c0_12], %14 {strides = array<i32>} : memref<8x1024xf32, #tpu.memory_space<vmem>>, vector<8x1024xf32>,
    return
  }
  func.func @transform_0(%arg0: i32) -> (i32, i32) {
    %c0_i32 = arith.constant 0 : i32
    %c0_i32_0 = arith.constant 0 : i32
    return %arg0, %c0_i32 : i32, i32
  }
  func.func @transform_1(%arg0: i32) -> (i32, i32) {
    %c0_i32 = arith.constant 0 : i32
    %c0_i32_0 = arith.constant 0 : i32
    %c0_i32_1 = arith.constant 0 : i32
    return %c0_i32, %c0_i32_0 : i32, i32
  }
  func.func @transform_2(%arg0: i32) -> (i32, i32) {
    %c0_i32 = arith.constant 0 : i32
    %c0_i32_0 = arith.constant 0 : i32
    %c0_i32_1 = arith.constant 0 : i32
    return %c0_i32, %c0_i32_0 : i32, i32
  }
  func.func @transform_3(%arg0: i32) -> (i32, i32) {
    %c0_i32 = arith.constant 0 : i32
    %c0_i32_0 = arith.constant 0 : i32
    %c0_i32_1 = arith.constant 0 : i32
    return %c0_i32, %c0_i32_0 : i32, i32
  }
  func.func @transform_4(%arg0: i32) -> (i32, i32) {
    %c0_i32 = arith.constant 0 : i32
    %c0_i32_0 = arith.constant 0 : i32
    %c0_i32_1 = arith.constant 0 : i32
    return %c0_i32, %c0_i32_0 : i32, i32
  }
  func.func @transform_5(%arg0: i32) -> (i32, i32) {
    %c0_i32 = arith.constant 0 : i32
    %c0_i32_0 = arith.constant 0 : i32
    return %arg0, %c0_i32 : i32, i32
  }
}

</mosaic_0001>

<bundles_post_ra>
// kernel: tpu_custom_call.1
= control target key start
LH: loop header
LB: loop body
LE: loop exit
PB: predicated region body
PF: predicated region fallthrough
CT: control target
= control target key end

     0   :  { %10 = vsyncpa [#allocation3], 0  ;;  %s1855_s0 = inlined_call_operand.hbm [shape: f32[8,1024], index: 0, kind: input, shape index: {}]   ;;  %s1856_s1 = inlined_call_operand.hbm [shape: bf16[1024,128], index: 1, kind: input, shape index: {}]   ;;  %s1857_s2 = inlined_call_operand.vmem [shape: f32[1,128], index: 2, kind: input, shape index: {}]   ;;  %s1858_s3 = inlined_call_operand.hbm [shape: bf16[128,1024], index: 3, kind: input, shape index: {}]   ;;  %s1859_s4 = inlined_call_operand.vmem [shape: f32[1,1024], index: 4, kind: input, shape index: {}]   ;;  %s1860_s5 = inlined_call_operand.hbm [shape: f32[8,1024], index: 5, kind: output, shape index: {}]  }
   0x1   :  { %11 = vsyncpa [#allocation6], 0 }
   0x2   :  { %12 = vsyncpa [#allocation4], 0  ;;  %s1756_s18 = smov [#allocation5]   ;;  %s1662_s22 = scalar_lea.hbm %s1856_s1, 8192 }
   0x3   :  { %s28_s19 = sshll.u32 %s1756_s18, 4  ;;  %p1663_p0 = scmp.ne.s32.totalorder %s1856_s1, %s1662_s22  ;;  %s29_s19 = int_to_ptr.vmem [resolvable:$true] %s28_s19 }
   0x4   :  { %p1666_p1 = scmp.lt.u32.totalorder %s1662_s22, %s1856_s1 }
   0x6   :  { %p1668_p2 = pnand %p1666_p1, %p1663_p0 }
   0x8   :  { %1671 = shalt.err (!%p1668_p2)
}
   0x9   :  { %s1672_s27 = scalar_lea.vmem %s29_s19, 8192  ;;  %p1677_p4 = scmp.lt.s32.totalorder %s29_s19, %s29_s19 }
   0xa   :  { %p1673_p3 = scmp.ne.s32.totalorder %s29_s19, %s1672_s27  ;;  %p1678_p5 = scmp.lt.s32.totalorder %s1672_s27, %s1672_s27 }
   0xc   :  { %p1679_p6 = por %p1678_p5, %p1677_p4 }
   0xe   :  { %p1680_p7 = pnand %p1679_p6, %p1673_p3 }
  0x10   :  { %1683 = shalt.err (!%p1680_p7)
}
  0x11   :  { %s1757_s28 = smov 64   ;;  %s1758_s29 = smov 4  }
  0x12   :  { %34 = dma.hbm_to_vmem [thread:$0]  %s1856_s1, 8192, %s29_s19, [#allocation6], %s1757_s28, %s1757_s28, %s1758_s29  }
  0x13   :  { %s1759_s7 = smov [#allocation2]   ;;  %s1760_s9 = smov [#allocation7]  }
  0x14   :  { %s19_s8 = sshll.u32 %s1759_s7, 4  ;;  %s42_s10 = sshll.u32 %s1760_s9, 4  ;;  %s20_s8 = int_to_ptr.vmem [resolvable:$true] %s19_s8  ;;  %s43_s10 = int_to_ptr.vmem [resolvable:$true] %s42_s10 }
  0x15   :  { %s1684_s13 = scalar_lea.hbm %s1855_s0, 1024 }
  0x16   :  { %p1685_p8 = scmp.ne.s32.totalorder %s1855_s0, %s1684_s13  ;;  %p1688_p9 = scmp.lt.u32.totalorder %s1684_s13, %s1855_s0 }
  0x18   :  { %p1690_p10 = pnand %p1688_p9, %p1685_p8 }
  0x1a   :  { %1693 = shalt.err (!%p1690_p10)
}
  0x1b   :  { %s1694_s1 = scalar_lea.vmem %s20_s8, 1024  ;;  %p1699_p12 = scmp.lt.s32.totalorder %s20_s8, %s20_s8 }
  0x1c   :  { %p1695_p11 = scmp.ne.s32.totalorder %s20_s8, %s1694_s1  ;;  %p1700_p13 = scmp.lt.s32.totalorder %s1694_s1, %s1694_s1 }
  0x1e   :  { %p1701_p0 = por %p1700_p13, %p1699_p12 }
  0x20   :  { %p1702_p1 = pnand %p1701_p0, %p1695_p11 }
  0x22   :  { %1705 = shalt.err (!%p1702_p1)
}
  0x23   :  { %22 = dma.hbm_to_vmem [thread:$0]  %s1855_s0, 1024, %s20_s8, [#allocation3]  }
  0x24   :  { %s1706_s22 = scalar_lea.hbm %s1858_s3, 8192 }
  0x25   :  { %p1707_p2 = scmp.ne.s32.totalorder %s1858_s3, %s1706_s22  ;;  %p1710_p3 = scmp.lt.u32.totalorder %s1706_s22, %s1858_s3 }
  0x27   :  { %p1712_p4 = pnand %p1710_p3, %p1707_p2 }
  0x29   :  { %1715 = shalt.err (!%p1712_p4)
}
  0x2a   :  { %s1716_s27 = scalar_lea.vmem %s43_s10, 8192  ;;  %p1721_p6 = scmp.lt.s32.totalorder %s43_s10, %s43_s10 }
  0x2b   :  { %p1717_p5 = scmp.ne.s32.totalorder %s43_s10, %s1716_s27  ;;  %p1722_p7 = scmp.lt.s32.totalorder %s1716_s27, %s1716_s27 }
  0x2d   :  { %p1723_p8 = por %p1722_p7, %p1721_p6 }
  0x2f   :  { %p1724_p9 = pnand %p1723_p8, %p1717_p5 }
  0x31   :  { %1727 = shalt.err (!%p1724_p9)
}
  0x32   :  { %s1761_s0 = smov 512   ;;  %s1762_s28 = smov 32  }
  0x33   :  { %48 = dma.hbm_to_vmem [thread:$0]  %s1858_s3, 8192, %s43_s10, [#allocation6], %s1761_s0, %s1761_s0, %s1762_s28  }
  0x34   :  { %1750 = dma.done.wait [#allocation3], 1024  }
  0x35   :  { %1751 = vsyncadd [#allocation3], 4294966272 }
  0x36   :  { %1752 = dma.done.wait [#allocation6], 16384  }
  0x37   :  { %1753 = vsyncadd [#allocation6], 4294950912  ;;  %v1598_v0 = vld [vmem:[#allocation5 + $0x40] sm:$0xff]   ;;  %v1602_v4 = vld [vmem:[#allocation5 + $0x48] sm:$0xff]  }
  0x38   :  { %v1599_v1 = vld [vmem:[#allocation5 + $0xc0] sm:$0xff]   ;;  %1501 = vmatprep.subr.bf16.mxu0 %v1598_v0  ;;  %v1603_v5 = vld [vmem:[#allocation5 + $0xc8] sm:$0xff]   ;;  %v1606_v8 = vld [vmem:[#allocation5 + $0x50] sm:$0xff]  }
  0x39   :  { %v1600_v2 = vld [vmem:[#allocation5] sm:$0xff]   ;;  %1523 = vmatprep.subr.bf16.mxu1 %v1599_v1  ;;  %v1604_v6 = vld [vmem:[#allocation5 + $0x8] sm:$0xff]   ;;  %v1607_v9 = vld [vmem:[#allocation5 + $0xd0] sm:$0xff]  }
  0x3a   :  { %v1601_v3 = vld [vmem:[#allocation5 + $0x80] sm:$0xff]   ;;  %1502 = vmatpush3.bf16.msra.mxu0 %v1600_v2  ;;  %v1605_v7 = vld [vmem:[#allocation5 + $0x88] sm:$0xff]   ;;  %v1608_v10 = vld [vmem:[#allocation5 + $0x10] sm:$0xff]  }
  0x3b   :  { %1524 = vmatpush3.bf16.msra.mxu1 %v1601_v3  ;;  %1503 = vmatprep.subr.bf16.mxu0 %v1602_v4  ;;  %v1609_v11 = vld [vmem:[#allocation5 + $0x90] sm:$0xff]   ;;  %v1610_v12 = vld [vmem:[#allocation5 + $0x58] sm:$0xff]   ;;  %v1614_v16 = vld [vmem:[#allocation5 + $0x60] sm:$0xff]  }
  0x3c   :  { %1525 = vmatprep.subr.bf16.mxu1 %v1603_v5  ;;  %v1611_v13 = vld [vmem:[#allocation5 + $0xd8] sm:$0xff]   ;;  %v1615_v17 = vld [vmem:[#allocation5 + $0xe0] sm:$0xff]   ;;  %v1618_v20 = vld [vmem:[#allocation5 + $0x68] sm:$0xff]  }
  0x3d   :  { %v1612_v14 = vld [vmem:[#allocation5 + $0x18] sm:$0xff]   ;;  %v1616_v18 = vld [vmem:[#allocation5 + $0x20] sm:$0xff]   ;;  %v1619_v21 = vld [vmem:[#allocation5 + $0xe8] sm:$0xff]  }
  0x3e   :  { %1504 = vmatpush3.bf16.msra.mxu0 %v1604_v6  ;;  %v1613_v15 = vld [vmem:[#allocation5 + $0x98] sm:$0xff]   ;;  %v1617_v19 = vld [vmem:[#allocation5 + $0xa0] sm:$0xff]   ;;  %v1620_v22 = vld [vmem:[#allocation5 + $0x28] sm:$0xff]  }
  0x3f   :  { %1526 = vmatpush3.bf16.msra.mxu1 %v1605_v7  ;;  %1505 = vmatprep.subr.bf16.mxu0 %v1606_v8  ;;  %v1621_v23 = vld [vmem:[#allocation5 + $0xa8] sm:$0xff]   ;;  %v1622_v24 = vld [vmem:[#allocation5 + $0x70] sm:$0xff]   ;;  %v1626_v28 = vld [vmem:[#allocation5 + $0x78] sm:$0xff]  }
  0x40   :  { %1527 = vmatprep.subr.bf16.mxu1 %v1607_v9  ;;  %v1623_v25 = vld [vmem:[#allocation5 + $0xf0] sm:$0xff]   ;;  %v1627_v29 = vld [vmem:[#allocation5 + $0xf8] sm:$0xff]   ;;  %v62_v32 = vld [vmem:[#allocation2 + $0x8] sm:$0xff] }
  0x41   :  { %v1624_v26 = vld [vmem:[#allocation5 + $0x30] sm:$0xff]   ;;  %v1628_v30 = vld [vmem:[#allocation5 + $0x38] sm:$0xff]   ;;  %v61_v34 = vld [vmem:[#allocation2] sm:$0xff]  ;;  %v70_v35 = vpack.c.bf16 %v62_v32, %v62_v32 }
  0x42   :  { %1506 = vmatpush3.bf16.msra.mxu0 %v1608_v10  ;;  %v1625_v27 = vld [vmem:[#allocation5 + $0xb0] sm:$0xff]   ;;  %v1629_v31 = vld [vmem:[#allocation5 + $0xb8] sm:$0xff]   ;;  %v69_v37 = vpack.c.bf16 %v61_v34, %v61_v34  ;;  %v1630_v40 = vld [vmem:[#allocation5 + $0x140] sm:$0xff]  }
  0x43   :  { %1528 = vmatpush3.bf16.msra.mxu1 %v1609_v11  ;;  %1507 = vmatprep.subr.bf16.mxu0 %v1610_v12  ;;  %v64_v33 = vld [vmem:[#allocation2 + $0x18] sm:$0xff]  ;;  %v63_v38 = vld [vmem:[#allocation2 + $0x10] sm:$0xff]  ;;  %v1631_v41 = vld [vmem:[#allocation5 + $0x1c0] sm:$0xff]  }
  0x44   :  { %1529 = vmatprep.subr.bf16.mxu1 %v1611_v13  ;;  %v72_v36 = vpack.c.bf16 %v64_v33, %v64_v33  ;;  %v71_v39 = vpack.c.bf16 %v63_v38, %v63_v38  ;;  %628 = vmatprep.mubr.bf16.mxu0 %v70_v35  ;;  %v1632_v42 = vld [vmem:[#allocation5 + $0x100] sm:$0xff]   ;;  %v1634_v44 = vld [vmem:[#allocation5 + $0x148] sm:$0xff]   ;;  %v1638_v48 = vld [vmem:[#allocation5 + $0x150] sm:$0xff]  }
  0x45   :  { %v1633_v43 = vld [vmem:[#allocation5 + $0x180] sm:$0xff]   ;;  %v1635_v45 = vld [vmem:[#allocation5 + $0x1c8] sm:$0xff]   ;;  %v1639_v49 = vld [vmem:[#allocation5 + $0x1d0] sm:$0xff]  }
  0x46   :  { %1508 = vmatpush3.bf16.msra.mxu0 %v1612_v14  ;;  %668 = vmatprep.mubr.bf16.mxu1 %v72_v36  ;;  %v1636_v46 = vld [vmem:[#allocation5 + $0x108] sm:$0xff]   ;;  %v1640_v50 = vld [vmem:[#allocation5 + $0x110] sm:$0xff]   ;;  %v1642_v52 = vld [vmem:[#allocation5 + $0x158] sm:$0xff]  }
  0x47   :  { %1530 = vmatpush3.bf16.msra.mxu1 %v1613_v15  ;;  %1509 = vmatprep.subr.bf16.mxu0 %v1614_v16  ;;  %v1637_v47 = vld [vmem:[#allocation5 + $0x188] sm:$0xff]   ;;  %v1641_v51 = vld [vmem:[#allocation5 + $0x190] sm:$0xff]   ;;  %v1643_v53 = vld [vmem:[#allocation5 + $0x1d8] sm:$0xff]  }
  0x48   :  { %1531 = vmatprep.subr.bf16.mxu1 %v1615_v17  ;;  %v1644_v54 = vld [vmem:[#allocation5 + $0x118] sm:$0xff]   ;;  %v1646_v56 = vld [vmem:[#allocation5 + $0x160] sm:$0xff]   ;;  %v1650_v60 = vld [vmem:[#allocation5 + $0x168] sm:$0xff]  }
  0x49   :  { %v1645_v55 = vld [vmem:[#allocation5 + $0x198] sm:$0xff]   ;;  %v1647_v57 = vld [vmem:[#allocation5 + $0x1e0] sm:$0xff]   ;;  %v1651_v61 = vld [vmem:[#allocation5 + $0x1e8] sm:$0xff]  }
  0x4a   :  { %1510 = vmatpush3.bf16.msra.mxu0 %v1616_v18  ;;  %v1648_v58 = vld [vmem:[#allocation5 + $0x120] sm:$0xff]   ;;  %v1652_v62 = vld [vmem:[#allocation5 + $0x128] sm:$0xff]   ;;  %v1654_v0 = vld [vmem:[#allocation5 + $0x170] sm:$0xff]  }
  0x4b   :  { %1532 = vmatpush3.bf16.msra.mxu1 %v1617_v19  ;;  %1511 = vmatprep.subr.bf16.mxu0 %v1618_v20  ;;  %v1649_v59 = vld [vmem:[#allocation5 + $0x1a0] sm:$0xff]   ;;  %v1653_v63 = vld [vmem:[#allocation5 + $0x1a8] sm:$0xff]   ;;  %v1655_v1 = vld [vmem:[#allocation5 + $0x1f0] sm:$0xff]  }
  0x4c   :  { %1533 = vmatprep.subr.bf16.mxu1 %v1619_v21  ;;  %v1656_v2 = vld [vmem:[#allocation5 + $0x130] sm:$0xff]   ;;  %v1658_v4 = vld [vmem:[#allocation5 + $0x178] sm:$0xff]   ;;  %v66_v8 = vld [vmem:[#allocation2 + $0x28] sm:$0xff] }
  0x4d   :  { %v1657_v3 = vld [vmem:[#allocation5 + $0x1b0] sm:$0xff]   ;;  %v1659_v5 = vld [vmem:[#allocation5 + $0x1f8] sm:$0xff]   ;;  %v74_v10 = vpack.c.bf16 %v66_v8, %v66_v8  ;;  %v65_v12 = vld [vmem:[#allocation2 + $0x20] sm:$0xff] }
  0x4e   :  { %1512 = vmatpush3.bf16.msra.mxu0 %v1620_v22  ;;  %v1660_v6 = vld [vmem:[#allocation5 + $0x138] sm:$0xff]   ;;  %v67_v13 = vld [vmem:[#allocation2 + $0x30] sm:$0xff]  ;;  %v73_v14 = vpack.c.bf16 %v65_v12, %v65_v12  ;;  %v758_v16 = vld [vmem:[#allocation7] sm:$0xff] }
  0x4f   :  { %1534 = vmatpush3.bf16.msra.mxu1 %v1621_v23  ;;  %1513 = vmatprep.subr.bf16.mxu0 %v1622_v24  ;;  %v1661_v7 = vld [vmem:[#allocation5 + $0x1b8] sm:$0xff]   ;;  %v75_v15 = vpack.c.bf16 %v67_v13, %v67_v13  ;;  %v762_v17 = vld [vmem:[#allocation7 + $0x20] sm:$0xff]  ;;  %v759_v18 = vld [vmem:[#allocation7 + $0x8] sm:$0xff] }
  0x50   :  { %1535 = vmatprep.subr.bf16.mxu1 %v1623_v25  ;;  %v68_v9 = vld [vmem:[#allocation2 + $0x38] sm:$0xff]  ;;  %v1437_v19 = vcombine.low %v758_v16, %v762_v17  ;;  %v1438_v20 = vcombine.high %v758_v16, %v762_v17  ;;  %v763_v21 = vld [vmem:[#allocation7 + $0x28] sm:$0xff]  ;;  %v766_v22 = vld [vmem:[#allocation7 + $0x40] sm:$0xff] }
  0x51   :  { %v76_v11 = vpack.c.bf16 %v68_v9, %v68_v9  ;;  %v770_v23 = vld [vmem:[#allocation7 + $0x60] sm:$0xff]  ;;  %v1439_v24 = vcombine.low %v759_v18, %v763_v21  ;;  %v1440_v25 = vcombine.high %v759_v18, %v763_v21  ;;  %v775_v32 = vld [vmem:[#allocation7 + $0x88] sm:$0xff]  ;;  %v760_v16 = vld [vmem:[#allocation7 + $0x10] sm:$0xff] }
  0x52   :  { %1514 = vmatpush3.bf16.msra.mxu0 %v1624_v26  ;;  %v1446_v26 = vcombine.high %v766_v22, %v770_v23  ;;  %v779_v33 = vld [vmem:[#allocation7 + $0xa8] sm:$0xff]  ;;  %v1445_v34 = vcombine.low %v766_v22, %v770_v23  ;;  %v782_v38 = vld [vmem:[#allocation7 + $0xc0] sm:$0xff]  ;;  %v764_v17 = vld [vmem:[#allocation7 + $0x30] sm:$0xff]  ;;  %v1763_v22 = vmov 0  }
  0x53   :  { %1536 = vmatpush3.bf16.msra.mxu1 %v1625_v27  ;;  %1515 = vmatprep.subr.bf16.mxu0 %v1626_v28  ;;  %v767_v27 = vld [vmem:[#allocation7 + $0x48] sm:$0xff]  ;;  %v814_v8 = vld [vmem:[#allocation7 + $0x1c0] sm:$0xff]  ;;  %v761_v18 = vld [vmem:[#allocation7 + $0x18] sm:$0xff] }
  0x54   :  { %1537 = vmatprep.subr.bf16.mxu1 %v1627_v29  ;;  %v771_v28 = vld [vmem:[#allocation7 + $0x68] sm:$0xff]  ;;  %v774_v29 = vld [vmem:[#allocation7 + $0x80] sm:$0xff]  ;;  %v765_v21 = vld [vmem:[#allocation7 + $0x38] sm:$0xff] }
  0x55   :  { %v1447_v35 = vcombine.low %v767_v27, %v771_v28  ;;  %v818_v9 = vld [vmem:[#allocation7 + $0x1e0] sm:$0xff]  ;;  %v819_v12 = vld [vmem:[#allocation7 + $0x1e8] sm:$0xff]  ;;  %v1443_v23 = vcombine.low %v761_v18, %v765_v21 }
  0x56   :  { %1516 = vmatpush3.bf16.msra.mxu0 %v1628_v30  ;;  %v1448_v30 = vcombine.high %v767_v27, %v771_v28  ;;  %v1493_v13 = vcombine.low %v814_v8, %v818_v9  ;;  %v1372_v27 = vld [vmem:[%s1857_s2] ss:$0 sm:$0xff] }
  0x57   :  { %1538 = vmatpush3.bf16.msra.mxu1 %v1629_v31  ;;  %1545 = vmatprep.subr.bf16.mxu0 %v1630_v40  ;;  %v778_v31 = vld [vmem:[#allocation7 + $0xa0] sm:$0xff]  ;;  %v783_v40 = vld [vmem:[#allocation7 + $0xc8] sm:$0xff] }
  0x58   :  { %1567 = vmatprep.subr.bf16.mxu1 %v1631_v41  ;;  %v1454_v36 = vcombine.high %v774_v29, %v778_v31  ;;  %v787_v41 = vld [vmem:[#allocation7 + $0xe8] sm:$0xff] }
  0x59   :  { %629 = vmatmul.mubr.bf16.vlgmr.msra.gmra.mrb[0].mxu0 %v69_v37  ;;  %v1456_v37 = vcombine.high %v775_v32, %v779_v33 }
  0x5a   :  { %669 = vmatmul.mubr.bf16.vlgmr.msra.gmra.mrb[0].mxu1 %v71_v39  ;;  %1546 = vmatpush3.bf16.msra.mxu0 %v1632_v42  ;;  %v786_v39 = vld [vmem:[#allocation7 + $0xe0] sm:$0xff]  ;;  %v1453_v42 = vcombine.low %v774_v29, %v778_v31 }
  0x5b   :  { %1568 = vmatpush3.bf16.msra.mxu1 %v1633_v43  ;;  %1547 = vmatprep.subr.bf16.mxu0 %v1634_v44  ;;  %v1455_v43 = vcombine.low %v775_v32, %v779_v33  ;;  %v1462_v44 = vcombine.high %v782_v38, %v786_v39 }
  0x5c   :  { %1569 = vmatprep.subr.bf16.mxu1 %v1635_v45  ;;  %708 = vmatprep.mubr.bf16.mxu0 %v74_v10  ;;  %v1464_v45 = vcombine.high %v783_v40, %v787_v41  ;;  %v815_v10 = vld [vmem:[#allocation7 + $0x1c8] sm:$0xff] }
  0x5d   :  { %748 = vmatprep.mubr.bf16.mxu1 %v76_v11  ;;  %v1494_v11 = vcombine.high %v814_v8, %v818_v9 }
  0x5e   :  { %1548 = vmatpush3.bf16.msra.mxu0 %v1636_v46  ;;  %v790_v46 = vld [vmem:[#allocation7 + $0x100] sm:$0xff] }
  0x5f   :  { %1570 = vmatpush3.bf16.msra.mxu1 %v1637_v47  ;;  %1549 = vmatprep.subr.bf16.mxu0 %v1638_v48  ;;  %v794_v47 = vld [vmem:[#allocation7 + $0x120] sm:$0xff]  ;;  %v791_v48 = vld [vmem:[#allocation7 + $0x108] sm:$0xff] }
  0x60   :  { %1571 = vmatprep.subr.bf16.mxu1 %v1639_v49  ;;  %v795_v49 = vld [vmem:[#allocation7 + $0x128] sm:$0xff] }
  0x62   :  { %1550 = vmatpush3.bf16.msra.mxu0 %v1640_v50  ;;  %v1461_v50 = vcombine.low %v782_v38, %v786_v39 }
  0x63   :  { %1572 = vmatpush3.bf16.msra.mxu1 %v1641_v51  ;;  %1551 = vmatprep.subr.bf16.mxu0 %v1642_v52  ;;  %v1463_v51 = vcombine.low %v783_v40, %v787_v41  ;;  %v1470_v52 = vcombine.high %v790_v46, %v794_v47 }
  0x64   :  { %1573 = vmatprep.subr.bf16.mxu1 %v1643_v53  ;;  %v1472_v53 = vcombine.high %v791_v48, %v795_v49 }
  0x66   :  { %1552 = vmatpush3.bf16.msra.mxu0 %v1644_v54  ;;  %v798_v54 = vld [vmem:[#allocation7 + $0x140] sm:$0xff] }
  0x67   :  { %1574 = vmatpush3.bf16.msra.mxu1 %v1645_v55  ;;  %1553 = vmatprep.subr.bf16.mxu0 %v1646_v56  ;;  %v802_v55 = vld [vmem:[#allocation7 + $0x160] sm:$0xff]  ;;  %v799_v56 = vld [vmem:[#allocation7 + $0x148] sm:$0xff] }
  0x68   :  { %1575 = vmatprep.subr.bf16.mxu1 %v1647_v57  ;;  %v803_v57 = vld [vmem:[#allocation7 + $0x168] sm:$0xff] }
  0x6a   :  { %1554 = vmatpush3.bf16.msra.mxu0 %v1648_v58  ;;  %v1469_v58 = vcombine.low %v790_v46, %v794_v47 }
  0x6b   :  { %1576 = vmatpush3.bf16.msra.mxu1 %v1649_v59  ;;  %1555 = vmatprep.subr.bf16.mxu0 %v1650_v60  ;;  %v1471_v59 = vcombine.low %v791_v48, %v795_v49  ;;  %v1478_v60 = vcombine.high %v798_v54, %v802_v55 }
  0x6c   :  { %1577 = vmatprep.subr.bf16.mxu1 %v1651_v61  ;;  %v1480_v61 = vcombine.high %v799_v56, %v803_v57 }
  0x6e   :  { %1556 = vmatpush3.bf16.msra.mxu0 %v1652_v62  ;;  %v1477_v62 = vcombine.low %v798_v54, %v802_v55 }
  0x6f   :  { %1578 = vmatpush3.bf16.msra.mxu1 %v1653_v63  ;;  %1557 = vmatprep.subr.bf16.mxu0 %v1654_v0  ;;  %v1479_v63 = vcombine.low %v799_v56, %v803_v57  ;;  %v806_v0 = vld [vmem:[#allocation7 + $0x180] sm:$0xff] }
  0x70   :  { %1579 = vmatprep.subr.bf16.mxu1 %v1655_v1  ;;  %v810_v1 = vld [vmem:[#allocation7 + $0x1a0] sm:$0xff] }
  0x72   :  { %1558 = vmatpush3.bf16.msra.mxu0 %v1656_v2  ;;  %v807_v2 = vld [vmem:[#allocation7 + $0x188] sm:$0xff] }
  0x73   :  { %1580 = vmatpush3.bf16.msra.mxu1 %v1657_v3  ;;  %1559 = vmatprep.subr.bf16.mxu0 %v1658_v4  ;;  %v1486_v3 = vcombine.high %v806_v0, %v810_v1  ;;  %v811_v4 = vld [vmem:[#allocation7 + $0x1a8] sm:$0xff] }
  0x74   :  { %1581 = vmatprep.subr.bf16.mxu1 %v1659_v5  ;;  %v1485_v5 = vcombine.low %v806_v0, %v810_v1 }
  0x76   :  { %1560 = vmatpush3.bf16.msra.mxu0 %v1660_v6  ;;  %v1487_v6 = vcombine.low %v807_v2, %v811_v4 }
  0x77   :  { %1582 = vmatpush3.bf16.msra.mxu1 %v1661_v7  ;;  %1184 = vmatprep.subr.bf16.mxu0 %v1438_v20  ;;  %v1488_v7 = vcombine.high %v807_v2, %v811_v4  ;;  %v1442_v20 = vcombine.high %v760_v16, %v764_v17  ;;  %v784_v2 = vld [vmem:[#allocation7 + $0xd0] sm:$0xff]  ;;  %v785_v4 = vld [vmem:[#allocation7 + $0xd8] sm:$0xff] }
  0x78   :  { %1225 = vmatprep.subr.bf16.mxu1 %v1440_v25 }
  0x79   :  { %709 = vmatmul.mubr.bf16.vlgmr.msra.gmra.mrb[4].mxu0 %v73_v14  ;;  %v1495_v14 = vcombine.low %v815_v10, %v819_v12 }
  0x7a   :  { %749 = vmatmul.mubr.bf16.vlgmr.msra.gmra.mrb[4].mxu1 %v75_v15  ;;  %1185 = vmatpush1.bf16.msra.mxu0 %v1437_v19  ;;  %v1496_v15 = vcombine.high %v815_v10, %v819_v12  ;;  %v1441_v19 = vcombine.low %v760_v16, %v764_v17  ;;  %v792_v10 = vld [vmem:[#allocation7 + $0x110] sm:$0xff]  ;;  %v793_v12 = vld [vmem:[#allocation7 + $0x118] sm:$0xff] }
  0x7b   :  { %1226 = vmatpush1.bf16.msra.mxu1 %v1439_v24  ;;  %1186 = vmatprep.subr.bf16.mxu0 %v1446_v26  ;;  %v1444_v24 = vcombine.high %v761_v18, %v765_v21  ;;  %v800_v18 = vld [vmem:[#allocation7 + $0x150] sm:$0xff]  ;;  %v805_v21 = vld [vmem:[#allocation7 + $0x178] sm:$0xff] }
  0x7c   :  { %1227 = vmatprep.subr.bf16.mxu1 %v1448_v30  ;;  %1216 = vmatprep.mubr.bf16.mxu0 %v1763_v22 }
  0x7d   :  { %1257 = vmatprep.mubr.bf16.mxu1 %v1763_v22 }
  0x7e   :  { %1187 = vmatpush1.bf16.msra.mxu0 %v1445_v34 }
  0x7f   :  { %1228 = vmatpush1.bf16.msra.mxu1 %v1447_v35  ;;  %1188 = vmatprep.subr.bf16.mxu0 %v1454_v36 }
  0x80   :  { %1229 = vmatprep.subr.bf16.mxu1 %v1456_v37 }
  0x82   :  { %1189 = vmatpush1.bf16.msra.mxu0 %v1453_v42 }
  0x83   :  { %1230 = vmatpush1.bf16.msra.mxu1 %v1455_v43  ;;  %1190 = vmatprep.subr.bf16.mxu0 %v1462_v44 }
  0x84   :  { %1231 = vmatprep.subr.bf16.mxu1 %v1464_v45 }
  0x86   :  { %1191 = vmatpush1.bf16.msra.mxu0 %v1461_v50  ;;  %v768_v50 = vld [vmem:[#allocation7 + $0x50] sm:$0xff] }
  0x87   :  { %1232 = vmatpush1.bf16.msra.mxu1 %v1463_v51  ;;  %1192 = vmatprep.subr.bf16.mxu0 %v1470_v52  ;;  %v772_v51 = vld [vmem:[#allocation7 + $0x70] sm:$0xff]  ;;  %v769_v52 = vld [vmem:[#allocation7 + $0x58] sm:$0xff] }
  0x88   :  { %1233 = vmatprep.subr.bf16.mxu1 %v1472_v53  ;;  %v773_v53 = vld [vmem:[#allocation7 + $0x78] sm:$0xff]  ;;  %v1450_v56 = vcombine.high %v768_v50, %v772_v51 }
  0x89   :  { %v1452_v57 = vcombine.high %v769_v52, %v773_v53 }
  0x8a   :  { %1193 = vmatpush1.bf16.msra.mxu0 %v1469_v58  ;;  %v776_v58 = vld [vmem:[#allocation7 + $0x90] sm:$0xff] }
  0x8b   :  { %1234 = vmatpush1.bf16.msra.mxu1 %v1471_v59  ;;  %1194 = vmatprep.subr.bf16.mxu0 %v1478_v60  ;;  %v780_v59 = vld [vmem:[#allocation7 + $0xb0] sm:$0xff]  ;;  %v777_v60 = vld [vmem:[#allocation7 + $0x98] sm:$0xff] }
  0x8c   :  { %1235 = vmatprep.subr.bf16.mxu1 %v1480_v61  ;;  %v781_v61 = vld [vmem:[#allocation7 + $0xb8] sm:$0xff]  ;;  %v1458_v0 = vcombine.high %v776_v58, %v780_v59 }
  0x8d   :  { %v1460_v1 = vcombine.high %v777_v60, %v781_v61 }
  0x8e   :  { %1195 = vmatpush1.bf16.msra.mxu0 %v1477_v62  ;;  %v1449_v62 = vcombine.low %v768_v50, %v772_v51 }
  0x8f   :  { %1236 = vmatpush1.bf16.msra.mxu1 %v1479_v63  ;;  %1196 = vmatprep.subr.bf16.mxu0 %v1486_v3  ;;  %v1451_v63 = vcombine.low %v769_v52, %v773_v53  ;;  %v788_v3 = vld [vmem:[#allocation7 + $0xf0] sm:$0xff] }
  0x90   :  { %1237 = vmatprep.subr.bf16.mxu1 %v1488_v7  ;;  %v1459_v7 = vcombine.low %v777_v60, %v781_v61  ;;  %v1466_v8 = vcombine.high %v784_v2, %v788_v3 }
  0x92   :  { %1197 = vmatpush1.bf16.msra.mxu0 %v1485_v5  ;;  %v789_v5 = vld [vmem:[#allocation7 + $0xf8] sm:$0xff] }
  0x93   :  { %1238 = vmatpush1.bf16.msra.mxu1 %v1487_v6  ;;  %1198 = vmatprep.subr.bf16.mxu0 %v1494_v11  ;;  %v1457_v6 = vcombine.low %v776_v58, %v780_v59  ;;  %v1468_v9 = vcombine.high %v785_v4, %v789_v5  ;;  %v796_v11 = vld [vmem:[#allocation7 + $0x130] sm:$0xff] }
  0x94   :  { %1239 = vmatprep.subr.bf16.mxu1 %v1496_v15  ;;  %v1467_v15 = vcombine.low %v785_v4, %v789_v5  ;;  %v1474_v16 = vcombine.high %v792_v10, %v796_v11 }
  0x96   :  { %1199 = vmatpush1.bf16.msra.mxu0 %v1493_v13  ;;  %v797_v13 = vld [vmem:[#allocation7 + $0x138] sm:$0xff] }
  0x97   :  { %1240 = vmatpush1.bf16.msra.mxu1 %v1495_v14  ;;  %1266 = vmatprep.subr.bf16.mxu0 %v1442_v20  ;;  %v1465_v14 = vcombine.low %v784_v2, %v788_v3  ;;  %v1476_v17 = vcombine.high %v793_v12, %v797_v13  ;;  %v801_v20 = vld [vmem:[#allocation7 + $0x158] sm:$0xff] }
  0x98   :  { %1307 = vmatprep.subr.bf16.mxu1 %v1444_v24 }
 0x12c   :  { %v1517_v25 = vpop.f32.mrb[0].mxu0 }
 0x12d   :  { %v1539_v26 = vpop.f32.mrb[0].mxu1  ;;  %v1518_v28 = vpop.f32.mrb[1].mxu0 }
 0x12e   :  { %v1540_v29 = vpop.f32.mrb[1].mxu1  ;;  %v1519_v30 = vadd.f32 %v1518_v28, %v1517_v25  ;;  %v1520_v32 = vpop.f32.mrb[2].mxu0  ;;  %v1484_v25 = vcombine.high %v801_v20, %v805_v21  ;;  %v809_v28 = vld [vmem:[#allocation7 + $0x198] sm:$0xff] }
 0x12f   :  { %v1541_v31 = vadd.f32 %v1540_v29, %v1539_v26  ;;  %v1542_v33 = vpop.f32.mrb[2].mxu1  ;;  %v1521_v34 = vpop.f32.mrb[3].mxu0  ;;  %v808_v26 = vld [vmem:[#allocation7 + $0x190] sm:$0xff]  ;;  %v813_v29 = vld [vmem:[#allocation7 + $0x1b8] sm:$0xff] }
 0x130   :  { %v1543_v35 = vpop.f32.mrb[3].mxu1  ;;  %v631_v36 = vadd.f32 %v1519_v30, %v1372_v27  ;;  %v812_v27 = vld [vmem:[#allocation7 + $0x1b0] sm:$0xff]  ;;  %v1492_v33 = vcombine.high %v809_v28, %v813_v29 }
 0x131   :  { %v1490_v32 = vcombine.high %v808_v26, %v812_v27  ;;  %v816_v34 = vld [vmem:[#allocation7 + $0x1d0] sm:$0xff] }
 0x132   :  { %v671_v37 = vadd.f32 %v1541_v31, %v631_v36  ;;  %v1483_v31 = vcombine.low %v801_v20, %v805_v21  ;;  %v820_v35 = vld [vmem:[#allocation7 + $0x1f0] sm:$0xff]  ;;  %v817_v36 = vld [vmem:[#allocation7 + $0x1d8] sm:$0xff] }
 0x14c   :  { %v1561_v38 = vpop.f32.mrb[4].mxu0 }
 0x14d   :  { %v1583_v39 = vpop.f32.mrb[4].mxu1  ;;  %v1562_v40 = vpop.f32.mrb[5].mxu0 }
 0x14e   :  { %v1563_v41 = vadd.f32 %v1562_v40, %v1561_v38  ;;  %v1584_v42 = vpop.f32.mrb[5].mxu1  ;;  %v1564_v43 = vpop.f32.mrb[6].mxu0  ;;  %v1489_v38 = vcombine.low %v808_v26, %v812_v27  ;;  %v1498_v40 = vcombine.high %v816_v34, %v820_v35 }
 0x14f   :  { %v1585_v44 = vadd.f32 %v1584_v42, %v1583_v39  ;;  %v1586_v45 = vpop.f32.mrb[6].mxu1  ;;  %v1565_v46 = vpop.f32.mrb[7].mxu0  ;;  %v1491_v39 = vcombine.low %v809_v28, %v813_v29  ;;  %v1497_v42 = vcombine.low %v816_v34, %v820_v35 }
 0x150   :  { %v711_v47 = vadd.f32 %v1563_v41, %v671_v37  ;;  %v1587_v48 = vpop.f32.mrb[7].mxu1  ;;  %v821_v37 = vld [vmem:[#allocation7 + $0x1f8] sm:$0xff] }
 0x151   :  { %v1500_v41 = vcombine.high %v817_v36, %v821_v37  ;;  %v1499_v43 = vcombine.low %v817_v36, %v821_v37  ;;  %v822_v48 = vld [vmem:[%s1859_s4] sm:$0xff]  ;;  %s1764_s4 = smov [#allocation8]  }
 0x152   :  { %v751_v49 = vadd.f32 %v1585_v44, %v711_v47  ;;  %v824_v44 = vlaneseq  ;;  %s1362_s8 = sshll.u32 %s1764_s4, 4  ;;  %s1363_s8 = int_to_ptr.vmem [resolvable:$true] %s1362_s8 }
 0x153   :  { %s1728_s9 = scalar_lea.vmem %s1363_s8, 1024  ;;  %p1733_p11 = scmp.lt.s32.totalorder %s1363_s8, %s1363_s8 }
 0x154   :  { %v756_v54 = vmax.f32 %v751_v49, 0.0  ;;  %v825_v45 = vshrl.u32 %v824_v44, 7  ;;  %p1729_p10 = scmp.ne.s32.totalorder %s1363_s8, %s1728_s9  ;;  %p1734_p12 = scmp.lt.s32.totalorder %s1728_s9, %s1728_s9 }
 0x156   :  { %v1834_v55 = vpack.c.bf16 %v756_v54, %v756_v54  ;;  %v826_v46 = vsub.s32 0, %v825_v45  ;;  %v834_v47 = vsub.s32 2, %v825_v45  ;;  %v830_v49 = vsub.s32 1, %v825_v45  ;;  %p1735_p13 = por %p1734_p12, %p1733_p11 }
 0x157   :  { %v838_v50 = vsub.s32 3, %v825_v45  ;;  %v842_v3 = vsub.s32 4, %v825_v45  ;;  %v850_v4 = vsub.s32 6, %v825_v45  ;;  %v846_v5 = vsub.s32 5, %v825_v45 }
 0x158   :  { %1217 = vmatmul.mubr.bf16.vlgmr.msra.gmra.mrb[8].mxu0 %v1834_v55  ;;  %1258 = vmatmul.mubr.bf16.vlgmr.msra.gmra.mrb[8].mxu1 %v1834_v55  ;;  %v827_v51 = vrot.slane %v822_v48, %v826_v46  ;;  %v835_v52 = vrot.slane %v822_v48, %v834_v47  ;;  %v831_v53 = vrot.slane %v822_v48, %v830_v49  ;;  %p1736_p0 = pnand %p1735_p13, %p1729_p10 }
 0x159   :  { %1267 = vmatpush1.bf16.msra.mxu0 %v1441_v19  ;;  %1308 = vmatpush1.bf16.msra.mxu1 %v1443_v23  ;;  %v804_v19 = vld [vmem:[#allocation7 + $0x170] sm:$0xff]  ;;  %v1475_v23 = vcombine.low %v793_v12, %v797_v13  ;;  %v839_v54 = vrot.slane %v822_v48, %v838_v50 }
 0x15a   :  { %1268 = vmatprep.subr.bf16.mxu0 %v1450_v56  ;;  %1309 = vmatprep.subr.bf16.mxu1 %v1452_v57  ;;  %v1482_v24 = vcombine.high %v800_v18, %v804_v19  ;;  %v1481_v30 = vcombine.low %v800_v18, %v804_v19 }
 0x15b   :  { %1298 = vmatprep.mubr.bf16.mxu0 %v1763_v22  ;;  %1339 = vmatprep.mubr.bf16.mxu1 %v1763_v22  ;;  %v1473_v22 = vcombine.low %v792_v10, %v796_v11 }
 0x15d   :  { %1269 = vmatpush1.bf16.msra.mxu0 %v1449_v62  ;;  %1310 = vmatpush1.bf16.msra.mxu1 %v1451_v63 }
 0x15e   :  { %1270 = vmatprep.subr.bf16.mxu0 %v1458_v0  ;;  %1311 = vmatprep.subr.bf16.mxu1 %v1460_v1 }
 0x161   :  { %1271 = vmatpush1.bf16.msra.mxu0 %v1457_v6  ;;  %1312 = vmatpush1.bf16.msra.mxu1 %v1459_v7  ;;  %v854_v6 = vsub.s32 7, %v825_v45  ;;  %v843_v7 = vrot.slane %v822_v48, %v842_v3 }
 0x162   :  { %1272 = vmatprep.subr.bf16.mxu0 %v1466_v8  ;;  %1313 = vmatprep.subr.bf16.mxu1 %v1468_v9  ;;  %v851_v8 = vrot.slane %v822_v48, %v850_v4  ;;  %v847_v9 = vrot.slane %v822_v48, %v846_v5 }
 0x163   :  { %v855_v10 = vrot.slane %v822_v48, %v854_v6 }
 0x165   :  { %1273 = vmatpush1.bf16.msra.mxu0 %v1465_v14  ;;  %1314 = vmatpush1.bf16.msra.mxu1 %v1467_v15 }
 0x166   :  { %1274 = vmatprep.subr.bf16.mxu0 %v1474_v16  ;;  %1315 = vmatprep.subr.bf16.mxu1 %v1476_v17 }
 0x169   :  { %1275 = vmatpush1.bf16.msra.mxu0 %v1473_v22  ;;  %1316 = vmatpush1.bf16.msra.mxu1 %v1475_v23 }
 0x16a   :  { %1276 = vmatprep.subr.bf16.mxu0 %v1482_v24  ;;  %1317 = vmatprep.subr.bf16.mxu1 %v1484_v25 }
 0x16d   :  { %1277 = vmatpush1.bf16.msra.mxu0 %v1481_v30  ;;  %1318 = vmatpush1.bf16.msra.mxu1 %v1483_v31 }
 0x16e   :  { %1278 = vmatprep.subr.bf16.mxu0 %v1490_v32  ;;  %1319 = vmatprep.subr.bf16.mxu1 %v1492_v33 }
 0x171   :  { %1279 = vmatpush1.bf16.msra.mxu0 %v1489_v38  ;;  %1320 = vmatpush1.bf16.msra.mxu1 %v1491_v39 }
 0x172   :  { %1280 = vmatprep.subr.bf16.mxu0 %v1498_v40  ;;  %1321 = vmatprep.subr.bf16.mxu1 %v1500_v41 }
 0x175   :  { %1281 = vmatpush1.bf16.msra.mxu0 %v1497_v42  ;;  %1322 = vmatpush1.bf16.msra.mxu1 %v1499_v43 }
 0x178   :  { %1299 = vmatmul.mubr.bf16.vlgmr.msra.gmra.mrb[12].mxu0 %v1834_v55  ;;  %1340 = vmatmul.mubr.bf16.vlgmr.msra.gmra.mrb[12].mxu1 %v1834_v55 }
 0x22b   :  { %v1218_v56 = vpop.f32.mrb[8].mxu0  ;;  %v1259_v57 = vpop.f32.mrb[8].mxu1 }
 0x22c   :  { %v1219_v58 = vadd.f32 %v1218_v56, %v827_v51  ;;  %v1260_v59 = vadd.f32 %v1259_v57, %v835_v52  ;;  %v1220_v60 = vpop.f32.mrb[9].mxu0  ;;  %v1261_v55 = vpop.f32.mrb[9].mxu1 }
 0x22d   :  { %v1221_v61 = vadd.f32 %v1220_v60, %v831_v53  ;;  %v1262_v62 = vadd.f32 %v1261_v55, %v839_v54  ;;  %v1222_v63 = vpop.f32.mrb[10].mxu0  ;;  %v1263_v0 = vpop.f32.mrb[10].mxu1 }
 0x22e   :  { %1348 = vst [vmem:[#allocation8] sm:$0xff] %v1219_v58  ;;  %1350 = vst [vmem:[#allocation8 + $0x10] sm:$0xff] %v1260_v59  ;;  %v1223_v1 = vpop.f32.mrb[11].mxu0  ;;  %v1264_v2 = vpop.f32.mrb[11].mxu1 }
 0x22f   :  { %1349 = vst [vmem:[#allocation8 + $0x8] sm:$0xff] %v1221_v61  ;;  %1351 = vst [vmem:[#allocation8 + $0x18] sm:$0xff] %v1262_v62 }
 0x24b   :  { %v1300_v11 = vpop.f32.mrb[12].mxu0  ;;  %v1341_v12 = vpop.f32.mrb[12].mxu1 }
 0x24c   :  { %v1301_v13 = vadd.f32 %v1300_v11, %v843_v7  ;;  %v1342_v14 = vadd.f32 %v1341_v12, %v851_v8  ;;  %v1302_v15 = vpop.f32.mrb[13].mxu0  ;;  %v1343_v16 = vpop.f32.mrb[13].mxu1 }
 0x24d   :  { %v1303_v17 = vadd.f32 %v1302_v15, %v847_v9  ;;  %v1344_v18 = vadd.f32 %v1343_v16, %v855_v10  ;;  %v1304_v19 = vpop.f32.mrb[14].mxu0  ;;  %v1345_v20 = vpop.f32.mrb[14].mxu1 }
 0x24e   :  { %1352 = vst [vmem:[#allocation8 + $0x20] sm:$0xff] %v1301_v13  ;;  %1354 = vst [vmem:[#allocation8 + $0x30] sm:$0xff] %v1342_v14  ;;  %v1305_v21 = vpop.f32.mrb[15].mxu0  ;;  %v1346_v22 = vpop.f32.mrb[15].mxu1 }
 0x24f   :  { %1353 = vst [vmem:[#allocation8 + $0x28] sm:$0xff] %v1303_v17  ;;  %1355 = vst [vmem:[#allocation8 + $0x38] sm:$0xff] %v1344_v18 }
 0x250   :  { %1739 = shalt.err (!%p1736_p0)
}
 0x251   :  { %s1740_s12 = scalar_lea.hbm %s1860_s5, 1024 }
 0x252   :  { %p1741_p1 = scmp.ne.s32.totalorder %s1860_s5, %s1740_s12  ;;  %p1744_p2 = scmp.lt.u32.totalorder %s1740_s12, %s1860_s5 }
 0x254   :  { %p1746_p3 = pnand %p1744_p2, %p1741_p1 }
 0x256   :  { %1749 = shalt.err (!%p1746_p3)
}
 0x257   :  { %1365 = dma.vmem_to_hbm [thread:$0]  %s1363_s8, 1024, %s1860_s5, [#allocation4]  }
 0x258   :  { %1754 = dma.done.wait [#allocation4], 1024  }
 0x259   :  { %1755 = vsyncadd [#allocation4], 4294966272 }
 0x25a   :  { %1369 = vsyncpa [#allocation3], 1 }
 0x25b   :  { %1370 = vsyncpa [#allocation6], 1 }
 0x25c   :  { %1371 = vsyncpa [#allocation4], 1 }

</bundles_post_ra>
